<compile_context>
chip_gen: v5e
topology: v5e:2x2
jax: 0.10.0
libtpu: 0.0.40
codegen_flags: <defaults>
</compile_context>

<pallas_src>
import numpy as np
import jax
import jax.numpy as jnp
from jax.experimental import pallas as pl
from jax.experimental.pallas import tpu as pltpu


_TARGET_ROWS = 512   # target MXU M-dimension per grid step
_LANE = 128


def _round_up(x, m):
    return -(-x // m) * m


# ----------------------------------------------------------------------------
# Deterministic parameter construction (Hann window, DFT basis, Slaney mel bank)
# ----------------------------------------------------------------------------
def hann_window(win_length: int, n_fft: int) -> np.ndarray:
    # torch.hann_window(win_length) is periodic: 0.5 * (1 - cos(2*pi*n / N))
    n = np.arange(win_length, dtype=np.float64)
    w = 0.5 * (1.0 - np.cos(2.0 * np.pi * n / win_length))
    if win_length < n_fft:           # torch.stft zero-pads the window to n_fft, centered
        left = (n_fft - win_length) // 2
        w = np.pad(w, (left, n_fft - win_length - left))
    return w.astype(np.float32)


def dft_matrices(n_fft: int) -> tuple[np.ndarray, np.ndarray]:
    # onesided DFT: F = n_fft // 2 + 1
    F = n_fft // 2 + 1
    k = np.arange(n_fft, dtype=np.float64)[:, None]
    f = np.arange(F, dtype=np.float64)[None, :]
    ang = 2.0 * np.pi * k * f / n_fft
    cos_mat = np.cos(ang).astype(np.float32)          # real-part basis
    sin_mat = (-np.sin(ang)).astype(np.float32)       # imag-part basis (torch sign)
    return cos_mat, sin_mat


def mel_filterbank(fs: int, n_fft: int, n_mels: int, fmin=None, fmax=None) -> np.ndarray:
    # librosa.filters.mel(htk=False, norm='slaney').T  -> (n_fft//2+1, n_mels)
    fmin = 0.0 if fmin is None else float(fmin)
    fmax = fs / 2.0 if fmax is None else float(fmax)
    f_sp = 200.0 / 3.0
    min_log_hz = 1000.0
    min_log_mel = min_log_hz / f_sp
    logstep = np.log(6.4) / 27.0

    def hz_to_mel(f):
        f = np.asarray(f, dtype=np.float64)
        mel = f / f_sp
        return np.where(f >= min_log_hz,
                        min_log_mel + np.log(np.maximum(f, 1e-12) / min_log_hz) / logstep,
                        mel)

    def mel_to_hz(m):
        m = np.asarray(m, dtype=np.float64)
        f = f_sp * m
        return np.where(m >= min_log_mel,
                        min_log_hz * np.exp(logstep * (m - min_log_mel)),
                        f)

    mels = np.linspace(hz_to_mel(fmin), hz_to_mel(fmax), n_mels + 2)
    mel_f = mel_to_hz(mels)
    fftfreqs = np.linspace(0.0, fs / 2.0, n_fft // 2 + 1)
    fdiff = np.diff(mel_f)
    ramps = mel_f[:, None] - fftfreqs[None, :]
    weights = np.zeros((n_mels, n_fft // 2 + 1), dtype=np.float64)
    for i in range(n_mels):
        lower = -ramps[i] / fdiff[i]
        upper = ramps[i + 2] / fdiff[i + 1]
        weights[i] = np.maximum(0.0, np.minimum(lower, upper))
    enorm = 2.0 / (mel_f[2:n_mels + 2] - mel_f[:n_mels])
    weights *= enorm[:, None]
    return weights.T.astype(np.float32)   # (F, n_mels)


# ----------------------------------------------------------------------------
# Pallas kernel: chunk pair -> windowed DFT (fused matmul) -> power -> mel -> log -> mask
# ----------------------------------------------------------------------------
def _frontend_kernel(chunks_ref, valid_ref, wdft_ref, mel_ref, out_ref):
    # chunks_ref: (rows, hop)   bf16, rows = G * (T+1)_pad, hop = 128
    # valid_ref : (rows, 1)     int32, 1 where frame t < feats_len of its (b, c)
    # wdft_ref  : (2*hop, 2*Fp) bf16, window-folded [cos | -sin] DFT basis
    # mel_ref   : (Fp, M_pad)   bf16, mel bank (Nyquist row dropped, cols zero-padded)
    # out_ref   : (rows, M_pad) f32
    x = chunks_ref[...]                                    # (rows, hop)
    w = wdft_ref[...]                                      # (2*hop, 2*Fp)
    hop = x.shape[1]
    # frame t = [chunk t | chunk t+1]  =>  dot(frame, W) = chunk_t @ W_top + chunk_{t+1} @ W_bot
    lo = jnp.dot(x, w[:hop, :], preferred_element_type=jnp.float32)
    hi = jnp.dot(x, w[hop:, :], preferred_element_type=jnp.float32)
    # Shift the "chunk t+1" contribution up by one row.  Wrapped / cross-stripe rows
    # land on t == T (or zero-pad) rows, which are masked here and discarded outside.
    y = lo + jnp.roll(hi, shift=-1, axis=0)                # (rows, 2*Fp) = [re | im]
    fp = y.shape[1] // 2
    re = y[:, :fp]
    im = y[:, fp:]
    power = re * re + im * im                              # (rows, Fp) f32
    mel = jnp.dot(power.astype(mel_ref.dtype), mel_ref[...],
                  preferred_element_type=jnp.float32)      # (rows, M_pad)
    logmel = jnp.log(jnp.maximum(mel, 1e-10))              # natural log, clamp 1e-10 (LogMel)
    out_ref[...] = jnp.where(valid_ref[...] > 0, logmel, 0.0)


class MultiChannelFrontendPallas:
    """mc=True path of MultiChannelFrontend (frontend_conf=None, apply_stft=True)."""

    def __init__(self, fs=16000, n_fft=256, frame_length=16, frame_shift=8,
                 n_mels=80, fmin=None, fmax=None):
        self.fs = fs
        self.n_fft = n_fft
        self.win_length = frame_length * 16
        self.hop_length = frame_shift * 16
        self.n_mels = n_mels
        assert self.win_length <= n_fft
        # The in-kernel chunked framing needs 50% overlap and 128-lane chunks.
        # TODO(synk): generic (n_fft, hop) configs need a gather-based framing fallback.
        assert n_fft == 2 * self.hop_length, "kernel assumes n_fft == 2 * hop_length"
        assert self.hop_length % _LANE == 0

        fp = n_fft // 2                       # onesided bins minus Nyquist (= 128)
        self.freq_pad = fp
        self.mel_pad = _round_up(n_mels, _LANE)

        win = hann_window(self.win_length, n_fft)                   # (n_fft,)
        cos_mat, sin_mat = dft_matrices(n_fft)                      # (n_fft, fp+1) each
        # Fold the Hann window into the DFT basis, fuse [cos | -sin] into one matrix,
        # and drop the Nyquist bin (its Slaney mel weight is (numerically) zero for
        # fmax <= fs/2), so Fp = 128 keeps everything lane-aligned.
        basis = np.concatenate([cos_mat[:, :fp], sin_mat[:, :fp]], axis=1)  # (n_fft, 2*fp)
        self.wdft = jnp.asarray(win[:, None] * basis, dtype=jnp.bfloat16)

        mel = mel_filterbank(fs, n_fft, n_mels, fmin, fmax)         # (fp+1, n_mels)
        mel_p = np.zeros((fp, self.mel_pad), dtype=np.float32)      # lane-dense output
        mel_p[:, :n_mels] = mel[:fp, :]
        self.melmat = jnp.asarray(mel_p, dtype=jnp.bfloat16)

    def output_size(self):
        return self.n_mels

    def __call__(self, x, input_lengths):
        # x: (B, Nsamples, C) float32, input_lengths: (B,) int32
        B, N, C = x.shape
        hop, n_fft = self.hop_length, self.n_fft
        pad = n_fft // 2
        T = N // hop + 1                       # center=True frame count
        tp1 = T + 1                            # hop-chunks per (b, c) stripe
        tp1_pad = _round_up(tp1, 16)
        feats_lens = (input_lengths // hop + 1).astype(jnp.int32)          # (B,)

        # --- hop-granular chunking: no 2x-overlapping frame tensor in HBM ---
        xc = jnp.transpose(x, (0, 2, 1)).reshape(B * C, N)                 # row order b*C + c
        xp = jnp.pad(xc, ((0, 0), (pad, pad)), mode="reflect")
        chunks = xp[:, :tp1 * hop].reshape(B * C, tp1, hop)

        bc = B * C
        lens_bc = jnp.repeat(feats_lens, C)                                # aligns with b*C + c
        # group size: feed the MXU >= ~_TARGET_ROWS rows per grid step when possible
        g = max(1, min(bc, _TARGET_ROWS // tp1_pad))
        num_blocks = -(-bc // g)
        bc_pad = num_blocks * g
        # TODO(synk): very long utterances (g * tp1_pad rows blowing VMEM) need a
        # time-tiled variant with manually overlapped DMA windows.

        chunks = jnp.pad(chunks, ((0, bc_pad - bc), (0, tp1_pad - tp1), (0, 0)))
        chunks2d = chunks.reshape(bc_pad * tp1_pad, hop).astype(jnp.bfloat16)
        lens_pad = jnp.pad(lens_bc, (0, bc_pad - bc))
        valid2d = (jnp.arange(tp1_pad, dtype=jnp.int32)[None, :]
                   < lens_pad[:, None]).astype(jnp.int32).reshape(bc_pad * tp1_pad, 1)

        fp, m_pad = self.freq_pad, self.mel_pad
        rows_total = bc_pad * tp1_pad
        rows_blk = g * tp1_pad
        cost = pl.CostEstimate(
            flops=int(rows_total * (2 * (2 * hop) * (2 * fp) + 2 * fp * m_pad)),
            transcendentals=int(rows_total * m_pad),
            bytes_accessed=int(chunks2d.size * 2 + valid2d.size * 4
                               + self.wdft.size * 2 + self.melmat.size * 2
                               + rows_total * m_pad * 4))

        out = pl.pallas_call(
            _frontend_kernel,
            out_shape=jax.ShapeDtypeStruct((rows_total, m_pad), jnp.float32),
            grid_spec=pltpu.PrefetchScalarGridSpec(
                num_scalar_prefetch=0,
                grid=(num_blocks,),
                in_specs=[
                    pl.BlockSpec((rows_blk, hop), lambda i: (i, 0)),
                    pl.BlockSpec((rows_blk, 1), lambda i: (i, 0)),
                    pl.BlockSpec((2 * hop, 2 * fp), lambda i: (0, 0)),
                    pl.BlockSpec((fp, m_pad), lambda i: (0, 0)),
                ],
                out_specs=pl.BlockSpec((rows_blk, m_pad), lambda i: (i, 0)),
            ),
            compiler_params=pltpu.CompilerParams(
                dimension_semantics=("parallel",)),
            cost_estimate=cost,
        )(chunks2d, valid2d, self.wdft, self.melmat)

        # mc=True 4-D branch of the torch module:
        #   (B, T, C, M).transpose(1, 2).reshape(B*C, T, M)
        # -> our rows are already in b*C + c order; drop bc/time/mel padding.
        feats = out.reshape(bc_pad, tp1_pad, m_pad)[:bc, :T, :self.n_mels]
        # NOTE: torch's literal `feats_lens.repeat(1, C).squeeze()` tiles the lengths,
        # which does NOT line up with the b*C + c row order of the reshaped features;
        # we return repeat-interleaved lengths that match the feature rows.
        out_lens = lens_bc
        return feats, out_lens, C


# ----------------------------------------------------------------------------
# Pure-JAX f32 (HIGHEST precision) reference of the mc=True forward, for checking.
# ----------------------------------------------------------------------------
def _reference_frontend(x, input_lengths, fe):
    B, N, C = x.shape
    n_fft, hop = fe.n_fft, fe.hop_length
    pad = n_fft // 2
    T = N // hop + 1
    xc = jnp.transpose(x, (0, 2, 1))
    xp = jnp.pad(xc, ((0, 0), (0, 0), (pad, pad)), mode="reflect")
    idx = jnp.arange(T)[:, None] * hop + jnp.arange(n_fft)[None, :]
    frames = xp[:, :, idx]                                            # (B, C, T, n_fft)
    win = jnp.asarray(hann_window(fe.win_length, n_fft))
    cos_mat, sin_mat = dft_matrices(n_fft)
    wf = frames * win
    hp = jax.lax.Precision.HIGHEST
    re = jnp.einsum("bctn,nf->bctf", wf, jnp.asarray(cos_mat), precision=hp)
    im = jnp.einsum("bctn,nf->bctf", wf, jnp.asarray(sin_mat), precision=hp)
    power = re * re + im * im
    melmat = jnp.asarray(mel_filterbank(fe.fs, n_fft, fe.n_mels))
    mel = jnp.einsum("bctf,fm->bctm", power, melmat, precision=hp)
    logmel = jnp.log(jnp.maximum(mel, 1e-10))
    feats_lens = input_lengths // hop + 1
    valid = jnp.arange(T)[None, None, :, None] < feats_lens[:, None, None, None]
    logmel = jnp.where(valid, logmel, 0.0)
    return logmel.reshape(B * C, T, fe.n_mels)


if __name__ == "__main__":
    # TODO(synk): non-mc branch (cmvn file parsing + random/selected channel pick) and
    # the optional WPE/MVDR `Frontend` (frontend_conf) are not exercised here.
    key = jax.random.PRNGKey(0)
    B, N, C = 2, 1024, 2
    x = jax.random.normal(key, (B, N, C), dtype=jnp.float32)
    input_lengths = jnp.array([1024, 896], dtype=jnp.int32)

    frontend = MultiChannelFrontendPallas(
        fs=16000, n_fft=256, frame_length=16, frame_shift=8, n_mels=80)
    feats, lens, channel_size = frontend(x, input_lengths)
    jax.block_until_ready(feats)

    T = N // frontend.hop_length + 1
    assert feats.shape == (B * C, T, 80), feats.shape
    assert lens.shape == (B * C,), lens.shape
    assert channel_size == C

    ref = _reference_frontend(x, input_lengths, frontend)
    err = jnp.abs(feats - ref)
    mean_err = float(jnp.mean(err))
    max_err = float(jnp.max(err))
    # bf16 MXU operands vs f32 HIGHEST-precision reference -> loose tolerances.
    assert mean_err < 5e-2, ("mean_err", mean_err, "max_err", max_err)
    assert max_err < 1.0, ("mean_err", mean_err, "max_err", max_err)
    print("KERNEL_OK")
</pallas_src>

<mosaic_0001>
module attributes {stable_mosaic.version = 11 : i64} {
  func.func @_frontend_kernel(%arg0: i32, %arg1: memref<64x128xbf16, #tpu.memory_space<vmem>>, %arg2: memref<64x1xi32, #tpu.memory_space<vmem>>, %arg3: memref<256x256xbf16, #tpu.memory_space<vmem>>, %arg4: memref<128x128xbf16, #tpu.memory_space<vmem>>, %arg5: memref<64x128xf32, #tpu.memory_space<vmem>>) attributes {dimension_semantics = [#tpu.dimension_semantics<parallel>], iteration_bounds = array<i64: 1>, scalar_prefetch = 0 : i64, scratch_operands = 0 : i64, tpu.core_type = #tpu.core_type<tc>, window_params = [{transform_indices = @transform_0, window_bounds = array<i64: 64, 128>}, {transform_indices = @transform_1, window_bounds = array<i64: 64, 1>}, {pipeline_mode = #tpu.pipeline_mode<synchronous>, transform_indices = @transform_2, window_bounds = array<i64: 256, 256>}, {pipeline_mode = #tpu.pipeline_mode<synchronous>, transform_indices = @transform_3, window_bounds = array<i64: 128, 128>}, {transform_indices = @transform_4, window_bounds = array<i64: 64, 128>}]} {
    %c0 = arith.constant 0 : index
    %c0_0 = arith.constant 0 : index
    %0 = vector.load %arg1[%c0, %c0_0] : memref<64x128xbf16, #tpu.memory_space<vmem>>, vector<64x128xbf16>
    %c0_1 = arith.constant 0 : index
    %c0_2 = arith.constant 0 : index
    %1 = vector.load %arg3[%c0_1, %c0_2] : memref<256x256xbf16, #tpu.memory_space<vmem>>, vector<256x256xbf16>
    %2 = vector.extract_strided_slice %1 {offsets = [0, 0], sizes = [128, 256], strides = [1, 1]} : vector<256x256xbf16> to vector<128x256xbf16>
    %cst = arith.constant dense<0.000000e+00> : vector<64x256xf32>
    %3 = tpu.matmul %0, %2, %cst {dimension_numbers = #tpu.dot_dimension_numbers<[1], [0], [0], [1], [0, 0, 1, 1], [], []>} : vector<64x128xbf16>, vector<128x256xbf16>, vector<64x256xf32> -> vector<64x256xf32>
    %4 = vector.extract_strided_slice %1 {offsets = [128, 0], sizes = [128, 256], strides = [1, 1]} : vector<256x256xbf16> to vector<128x256xbf16>
    %cst_3 = arith.constant dense<0.000000e+00> : vector<64x256xf32>
    %5 = tpu.matmul %0, %4, %cst_3 {dimension_numbers = #tpu.dot_dimension_numbers<[1], [0], [0], [1], [0, 0, 1, 1], [], []>} : vector<64x128xbf16>, vector<128x256xbf16>, vector<64x256xf32> -> vector<64x256xf32>
    %6 = vector.extract_strided_slice %5 {offsets = [1, 0], sizes = [63, 256], strides = [1, 1]} : vector<64x256xf32> to vector<63x256xf32>
    %7 = vector.extract_strided_slice %5 {offsets = [0, 0], sizes = [1, 256], strides = [1, 1]} : vector<64x256xf32> to vector<1x256xf32>
    %8 = tpu.concatenate %6, %7 in 0 : vector<63x256xf32>, vector<1x256xf32> -> vector<64x256xf32>
    %9 = arith.addf %3, %8 : vector<64x256xf32>
    %10 = vector.extract_strided_slice %9 {offsets = [0, 0], sizes = [64, 128], strides = [1, 1]} : vector<64x256xf32> to vector<64x128xf32>
    %11 = vector.extract_strided_slice %9 {offsets = [0, 128], sizes = [64, 128], strides = [1, 1]} : vector<64x256xf32> to vector<64x128xf32>
    %12 = arith.mulf %10, %10 : vector<64x128xf32>
    %13 = arith.mulf %11, %11 : vector<64x128xf32>
    %14 = arith.addf %12, %13 : vector<64x128xf32>
    %15 = arith.truncf %14 : vector<64x128xf32> to vector<64x128xbf16>
    %c0_4 = arith.constant 0 : index
    %c0_5 = arith.constant 0 : index
    %16 = vector.load %arg4[%c0_4, %c0_5] : memref<128x128xbf16, #tpu.memory_space<vmem>>, vector<128x128xbf16>
    %cst_6 = arith.constant dense<0.000000e+00> : vector<64x128xf32>
    %17 = tpu.matmul %15, %16, %cst_6 {dimension_numbers = #tpu.dot_dimension_numbers<[1], [0], [0], [1], [0, 0, 1, 1], [], []>} : vector<64x128xbf16>, vector<128x128xbf16>, vector<64x128xf32> -> vector<64x128xf32>
    %cst_7 = arith.constant 1.000000e-10 : f32
    %18 = vector.broadcast %cst_7 : f32 to vector<64x128xf32>
    %19 = arith.maximumf %17, %18 : vector<64x128xf32>
    %20 = math.log %19 : vector<64x128xf32>
    %c0_8 = arith.constant 0 : index
    %c0_9 = arith.constant 0 : index
    %21 = vector.load %arg2[%c0_8, %c0_9] : memref<64x1xi32, #tpu.memory_space<vmem>>, vector<64x1xi32>
    %c0_i32 = arith.constant 0 : i32
    %22 = vector.broadcast %c0_i32 : i32 to vector<64x1xi32>
    %23 = arith.cmpi sgt, %21, %22 : vector<64x1xi32>
    %cst_10 = arith.constant 0.000000e+00 : f32
    %24 = vector.shape_cast %23 : vector<64x1xi1> to vector<64x1xi1>
    %25 = vector.broadcast %24 : vector<64x1xi1> to vector<64x128xi1>
    %26 = vector.broadcast %cst_10 : f32 to vector<64x128xf32>
    %27 = arith.select %25, %20, %26 : vector<64x128xi1>, vector<64x128xf32>
    %c0_11 = arith.constant 0 : index
    %c0_12 = arith.constant 0 : index
    %28 = vector.load %arg5[%c0_11, %c0_12] : memref<64x128xf32, #tpu.memory_space<vmem>>, vector<64x128xf32>
    tpu.vector_store %arg5[%c0_11, %c0_12], %27 {strides = array<i32>} : memref<64x128xf32, #tpu.memory_space<vmem>>, vector<64x128xf32>,
    return
  }
  func.func @transform_0(%arg0: i32) -> (i32, i32) {
    %c0_i32 = arith.constant 0 : i32
    %c0_i32_0 = arith.constant 0 : i32
    return %arg0, %c0_i32 : i32, i32
  }
  func.func @transform_1(%arg0: i32) -> (i32, i32) {
    %c0_i32 = arith.constant 0 : i32
    %c0_i32_0 = arith.constant 0 : i32
    return %arg0, %c0_i32 : i32, i32
  }
  func.func @transform_2(%arg0: i32) -> (i32, i32) {
    %c0_i32 = arith.constant 0 : i32
    %c0_i32_0 = arith.constant 0 : i32
    %c0_i32_1 = arith.constant 0 : i32
    return %c0_i32, %c0_i32_0 : i32, i32
  }
  func.func @transform_3(%arg0: i32) -> (i32, i32) {
    %c0_i32 = arith.constant 0 : i32
    %c0_i32_0 = arith.constant 0 : i32
    %c0_i32_1 = arith.constant 0 : i32
    return %c0_i32, %c0_i32_0 : i32, i32
  }
  func.func @transform_4(%arg0: i32) -> (i32, i32) {
    %c0_i32 = arith.constant 0 : i32
    %c0_i32_0 = arith.constant 0 : i32
    return %arg0, %c0_i32 : i32, i32
  }
}

</mosaic_0001>

<bundles_post_ra>
// kernel: tpu_custom_call.1
= control target key start
LH: loop header
LB: loop body
LE: loop exit
PB: predicated region body
PF: predicated region fallthrough
CT: control target
= control target key end

     0   :  { %9 = vsyncpa [#allocation3], 0  ;;  %s1195_s0 = inlined_call_operand.hbm [shape: bf16[64,128], index: 0, kind: input, shape index: {}]   ;;  %s1196_s1 = inlined_call_operand.vmem [shape: s32[64,1], index: 1, kind: input, shape index: {}]   ;;  %s1197_s2 = inlined_call_operand.hbm [shape: bf16[256,256], index: 2, kind: input, shape index: {}]   ;;  %s1198_s3 = inlined_call_operand.vmem [shape: bf16[128,128], index: 3, kind: input, shape index: {}]   ;;  %s1199_s4 = inlined_call_operand.hbm [shape: f32[64,128], index: 4, kind: output, shape index: {}]  }
   0x1   :  { %10 = vsyncpa [#allocation6], 0 }
   0x2   :  { %11 = vsyncpa [#allocation4], 0  ;;  %s16_s17 = sshll.u32 %s1195_s0, 4  ;;  %s1035_s18 = smov [#allocation2]   ;;  %s17_s17 = int_to_ptr.hbm [resolvable:$true] %s16_s17 }
   0x3   :  { %s18_s19 = sshll.u32 %s1035_s18, 4  ;;  %s31_s22 = sshll.u32 %s1197_s2, 4  ;;  %s19_s19 = int_to_ptr.vmem [resolvable:$true] %s18_s19  ;;  %s32_s22 = int_to_ptr.hbm [resolvable:$true] %s31_s22 }
   0x4   :  { %s1036_s23 = smov 64   ;;  %s1037_s24 = smov 4  }
   0x5   :  { %24 = dma.hbm_to_vmem [thread:$0]  %s17_s17, 512, %s19_s19, [#allocation3], %s1036_s23, %s1036_s23, %s1037_s24  }
   0x6   :  { %s1038_s25 = smov [#allocation5]   ;;  %s1039_s27 = smov 128  }
   0x7   :  { %s33_s26 = sshll.u32 %s1038_s25, 4  ;;  %s1040_s28 = smov 8   ;;  %s34_s26 = int_to_ptr.vmem [resolvable:$true] %s33_s26 }
   0x8   :  { %39 = dma.hbm_to_vmem [thread:$0]  %s32_s22, 4096, %s34_s26, [#allocation6], %s1039_s27, %s1039_s27, %s1040_s28  }
   0x9   :  { %1029 = dma.done.wait [#allocation3], 512  }
   0xa   :  { %1030 = vsyncadd [#allocation3], 4294966784 }
   0xb   :  { %1031 = dma.done.wait [#allocation6], 4096  }
   0xc   :  { %1032 = vsyncadd [#allocation6], 4294963200  ;;  %v768_v0 = vld [vmem:[#allocation5 + $0xf0] sm:$0xf]  ;;  %v905_v1 = vld [vmem:[#allocation5 + $0xf4] sm:$0xf0] }
   0xd   :  { %v832_v2 = vld [vmem:[#allocation5 + $0x70] sm:$0xf]  ;;  %v769_v3 = vor.u32 %v905_v1, %v768_v0  ;;  %v889_v4 = vld [vmem:[#allocation5 + $0x74] sm:$0xf0]  ;;  %v760_v5 = vld [vmem:[#allocation5 + $0xe0] sm:$0xf] }
   0xe   :  { %v903_v6 = vld [vmem:[#allocation5 + $0xe4] sm:$0xf0]  ;;  %v833_v7 = vor.u32 %v889_v4, %v832_v2  ;;  %v824_v8 = vld [vmem:[#allocation5 + $0x60] sm:$0xf]  ;;  %v752_v12 = vld [vmem:[#allocation5 + $0xd0] sm:$0xf] }
   0xf   :  { %v887_v9 = vld [vmem:[#allocation5 + $0x64] sm:$0xf0]  ;;  %194 = vmatpush.bf16.msra.mxu0 %v769_v3  ;;  %914 = vmatpush.bf16.msra.mxu1 %v769_v3  ;;  %v761_v10 = vor.u32 %v903_v6, %v760_v5  ;;  %v901_v13 = vld [vmem:[#allocation5 + $0xd4] sm:$0xf0]  ;;  %v816_v14 = vld [vmem:[#allocation5 + $0x50] sm:$0xf] }
  0x10   :  { %399 = vmatpush.bf16.msra.mxu2 %v833_v7  ;;  %v825_v11 = vor.u32 %v887_v9, %v824_v8  ;;  %v885_v15 = vld [vmem:[#allocation5 + $0x54] sm:$0xf0]  ;;  %v753_v16 = vor.u32 %v901_v13, %v752_v12  ;;  %v744_v17 = vld [vmem:[#allocation5 + $0xc0] sm:$0xf]  ;;  %v899_v19 = vld [vmem:[#allocation5 + $0xc4] sm:$0xf0] }
  0x11   :  { %v817_v18 = vor.u32 %v885_v15, %v816_v14  ;;  %v888_v20 = vld [vmem:[#allocation5 + $0x74] sm:$0xf]  ;;  %v834_v21 = vld [vmem:[#allocation5 + $0x78] sm:$0xf0]  ;;  %v808_v22 = vld [vmem:[#allocation5 + $0x40] sm:$0xf]  ;;  %v745_v27 = vor.u32 %v899_v19, %v744_v17 }
  0x12   :  { %v883_v23 = vld [vmem:[#allocation5 + $0x44] sm:$0xf0]  ;;  %v837_v24 = vor.u32 %v888_v20, %v834_v21  ;;  %v886_v25 = vld [vmem:[#allocation5 + $0x64] sm:$0xf]  ;;  %v826_v26 = vld [vmem:[#allocation5 + $0x68] sm:$0xf0] }
  0x13   :  { %195 = vmatpush.bf16.msra.mxu0 %v761_v10  ;;  %915 = vmatpush.bf16.msra.mxu1 %v761_v10  ;;  %v809_v28 = vor.u32 %v883_v23, %v808_v22  ;;  %v736_v29 = vld [vmem:[#allocation5 + $0xb0] sm:$0xf]  ;;  %v897_v30 = vld [vmem:[#allocation5 + $0xb4] sm:$0xf0]  ;;  %v829_v32 = vor.u32 %v886_v25, %v826_v26  ;;  %v884_v34 = vld [vmem:[#allocation5 + $0x54] sm:$0xf] }
  0x14   :  { %400 = vmatpush.bf16.msra.mxu2 %v825_v11  ;;  %v800_v31 = vld [vmem:[#allocation5 + $0x30] sm:$0xf]  ;;  %428 = vmatpush.bf16.msra.mxu3 %v837_v24  ;;  %v881_v33 = vld [vmem:[#allocation5 + $0x34] sm:$0xf0]  ;;  %v818_v35 = vld [vmem:[#allocation5 + $0x58] sm:$0xf0]  ;;  %v737_v36 = vor.u32 %v897_v30, %v736_v29 }
  0x15   :  { %v801_v37 = vor.u32 %v881_v33, %v800_v31  ;;  %v728_v38 = vld [vmem:[#allocation5 + $0xa0] sm:$0xf]  ;;  %v895_v39 = vld [vmem:[#allocation5 + $0xa4] sm:$0xf0]  ;;  %v821_v41 = vor.u32 %v884_v34, %v818_v35  ;;  %v882_v43 = vld [vmem:[#allocation5 + $0x44] sm:$0xf] }
  0x16   :  { %v792_v40 = vld [vmem:[#allocation5 + $0x20] sm:$0xf]  ;;  %v879_v42 = vld [vmem:[#allocation5 + $0x24] sm:$0xf0]  ;;  %v810_v44 = vld [vmem:[#allocation5 + $0x48] sm:$0xf0]  ;;  %v729_v45 = vor.u32 %v895_v39, %v728_v38 }
  0x17   :  { %196 = vmatpush.bf16.msra.mxu0 %v753_v16  ;;  %916 = vmatpush.bf16.msra.mxu1 %v753_v16  ;;  %v793_v46 = vor.u32 %v879_v42, %v792_v40  ;;  %v720_v47 = vld [vmem:[#allocation5 + $0x90] sm:$0xf]  ;;  %v893_v48 = vld [vmem:[#allocation5 + $0x94] sm:$0xf0]  ;;  %v813_v50 = vor.u32 %v882_v43, %v810_v44  ;;  %v880_v52 = vld [vmem:[#allocation5 + $0x34] sm:$0xf] }
  0x18   :  { %401 = vmatpush.bf16.msra.mxu2 %v817_v18  ;;  %429 = vmatpush.bf16.msra.mxu3 %v829_v32  ;;  %v784_v49 = vld [vmem:[#allocation5 + $0x10] sm:$0xf]  ;;  %v877_v51 = vld [vmem:[#allocation5 + $0x14] sm:$0xf0]  ;;  %v802_v53 = vld [vmem:[#allocation5 + $0x38] sm:$0xf0]  ;;  %v721_v54 = vor.u32 %v893_v48, %v720_v47 }
  0x19   :  { %v785_v55 = vor.u32 %v877_v51, %v784_v49  ;;  %v712_v56 = vld [vmem:[#allocation5 + $0x80] sm:$0xf]  ;;  %v891_v57 = vld [vmem:[#allocation5 + $0x84] sm:$0xf0]  ;;  %v805_v59 = vor.u32 %v880_v52, %v802_v53  ;;  %v904_v61 = vld [vmem:[#allocation5 + $0xf4] sm:$0xf] }
  0x1a   :  { %v776_v58 = vld [vmem:[#allocation5] sm:$0xf]  ;;  %v875_v60 = vld [vmem:[#allocation5 + $0x4] sm:$0xf0]  ;;  %v770_v62 = vld [vmem:[#allocation5 + $0xf8] sm:$0xf0]  ;;  %v713_v1 = vor.u32 %v891_v57, %v712_v56 }
  0x1b   :  { %197 = vmatpush.bf16.msra.mxu0 %v745_v27  ;;  %917 = vmatpush.bf16.msra.mxu1 %v745_v27  ;;  %v878_v63 = vld [vmem:[#allocation5 + $0x24] sm:$0xf]  ;;  %v794_v0 = vld [vmem:[#allocation5 + $0x28] sm:$0xf0]  ;;  %v777_v2 = vor.u32 %v875_v60, %v776_v58  ;;  %v773_v3 = vor.u32 %v904_v61, %v770_v62  ;;  %v872_v8 = vld [vmem:[#allocation2 + $0x10] sm:$0xff]  ;;  %vm268_vm0 = vcmask 1046528  }
  0x1c   :  { %402 = vmatpush.bf16.msra.mxu2 %v809_v28  ;;  %430 = vmatpush.bf16.msra.mxu3 %v821_v41  ;;  %v870_v4 = vld [vmem:[#allocation2] sm:$0xff]  ;;  %v762_v6 = vld [vmem:[#allocation5 + $0xe8] sm:$0xf0]  ;;  %v797_v7 = vor.u32 %v878_v63, %v794_v0  ;;  %v876_v9 = vld [vmem:[#allocation5 + $0x14] sm:$0xf]  ;;  %s680_s9 = sshll.u32 %s1199_s4, 4  ;;  %s681_s9 = int_to_ptr.hbm [resolvable:$true] %s680_s9 }
  0x1d   :  { %v902_v5 = vld [vmem:[#allocation5 + $0xe4] sm:$0xf]  ;;  %v786_v10 = vld [vmem:[#allocation5 + $0x18] sm:$0xf0]  ;;  %v900_v12 = vld [vmem:[#allocation5 + $0xd4] sm:$0xf] }
  0x1e   :  { %v765_v11 = vor.u32 %v902_v5, %v762_v6  ;;  %v754_v13 = vld [vmem:[#allocation5 + $0xd8] sm:$0xf0]  ;;  %v789_v14 = vor.u32 %v876_v9, %v786_v10  ;;  %v874_v15 = vld [vmem:[#allocation5 + $0x4] sm:$0xf]  ;;  %v778_v16 = vld [vmem:[#allocation5 + $0x8] sm:$0xf0] }
  0x1f   :  { %198 = vmatpush.bf16.msra.mxu0 %v737_v36  ;;  %918 = vmatpush.bf16.msra.mxu1 %v737_v36  ;;  %v757_v17 = vor.u32 %v900_v12, %v754_v13  ;;  %v898_v18 = vld [vmem:[#allocation5 + $0xc4] sm:$0xf]  ;;  %v746_v19 = vld [vmem:[#allocation5 + $0xc8] sm:$0xf0]  ;;  %v781_v20 = vor.u32 %v874_v15, %v778_v16  ;;  %v896_v22 = vld [vmem:[#allocation5 + $0xb4] sm:$0xf] }
  0x20   :  { %403 = vmatpush.bf16.msra.mxu2 %v801_v37  ;;  %431 = vmatpush.bf16.msra.mxu3 %v813_v50  ;;  %v749_v21 = vor.u32 %v898_v18, %v746_v19  ;;  %v738_v23 = vld [vmem:[#allocation5 + $0xb8] sm:$0xf0]  ;;  %v894_v25 = vld [vmem:[#allocation5 + $0xa4] sm:$0xf]  ;;  %v730_v26 = vld [vmem:[#allocation5 + $0xa8] sm:$0xf0] }
  0x21   :  { %v741_v24 = vor.u32 %v896_v22, %v738_v23  ;;  %v871_v27 = vld [vmem:[#allocation2 + $0x8] sm:$0xff]  ;;  %v873_v28 = vld [vmem:[#allocation2 + $0x18] sm:$0xff]  ;;  %v733_v29 = vor.u32 %v894_v25, %v730_v26  ;;  %v892_v30 = vld [vmem:[#allocation5 + $0x94] sm:$0xf] }
  0x22   :  { %v722_v31 = vld [vmem:[#allocation5 + $0x98] sm:$0xf0]  ;;  %v890_v33 = vld [vmem:[#allocation5 + $0x84] sm:$0xf]  ;;  %v714_v34 = vld [vmem:[#allocation5 + $0x88] sm:$0xf0] }
  0x23   :  { %199 = vmatpush.bf16.msra.mxu0 %v729_v45  ;;  %919 = vmatpush.bf16.msra.mxu1 %v729_v45  ;;  %v725_v32 = vor.u32 %v892_v30, %v722_v31  ;;  %v717_v35 = vor.u32 %v890_v33, %v714_v34  ;;  %v913_v36 = vld [vmem:[%s1198_s3 + $0x38] sm:$0xff]  ;;  %v912_v38 = vld [vmem:[%s1198_s3 + $0x30] sm:$0xff]  ;;  %v911_v39 = vld [vmem:[%s1198_s3 + $0x28] sm:$0xff] }
  0x24   :  { %404 = vmatpush.bf16.msra.mxu2 %v793_v46  ;;  %432 = vmatpush.bf16.msra.mxu3 %v805_v59  ;;  %v910_v41 = vld [vmem:[%s1198_s3 + $0x20] sm:$0xff]  ;;  %v909_v45 = vld [vmem:[%s1198_s3 + $0x18] sm:$0xff]  ;;  %v908_v47 = vld [vmem:[%s1198_s3 + $0x10] sm:$0xff] }
  0x25   :  { %v907_v51 = vld [vmem:[%s1198_s3 + $0x8] sm:$0xff]  ;;  %v602_v12 = vld [vmem:[%s1196_s1] sm:$0xff] }
  0x26   :  { %vm610_vm1 = vcmp.gt.s32.totalorder %v602_v12, 0  ;;  %v603_v26 = vld [vmem:[%s1196_s1 + $0x8] sm:$0xff] }
  0x27   :  { %200 = vmatpush.bf16.msra.mxu0 %v721_v54  ;;  %920 = vmatpush.bf16.msra.mxu1 %v721_v54  ;;  %vm611_vm2 = vcmp.gt.s32.totalorder %v603_v26, 0 }
  0x28   :  { %405 = vmatpush.bf16.msra.mxu2 %v785_v55  ;;  %433 = vmatpush.bf16.msra.mxu3 %v797_v7  ;;  %v906_v55 = vld [vmem:[%s1198_s3] sm:$0xff] }
  0x2b   :  { %201 = vmatpush.bf16.msra.mxu0 %v713_v1  ;;  %921 = vmatpush.bf16.msra.mxu1 %v713_v1 }
  0x2c   :  { %406 = vmatpush.bf16.msra.mxu2 %v777_v2  ;;  %434 = vmatpush.bf16.msra.mxu3 %v789_v14 }
  0x2e   :  { %202 = vmatmul.bf16.vlgmr.msra.gmra.mxu0 %v870_v4  ;;  %212 = vmatmul.bf16.vlgmr.msra.gmra.mxu1 %v872_v8 }
  0x2f   :  { %223 = vmatpush.bf16.msrb.mxu1 %v773_v3  ;;  %407 = vmatmul.bf16.vlgmr.msra.gmra.mxu2 %v870_v4 }
  0x30   :  { %435 = vmatpush.bf16.msra.mxu3 %v781_v20  ;;  %549 = vmatpush.bf16.msrb.mxu0 %v913_v36 }
  0x31   :  { %922 = vmatpush.bf16.msrb.mxu2 %v913_v36 }
  0x33   :  { %224 = vmatpush.bf16.msrb.mxu1 %v765_v11  ;;  %436 = vmatmul.bf16.vlgmr.msra.gmra.mxu3 %v870_v4 }
  0x34   :  { %550 = vmatpush.bf16.msrb.mxu0 %v912_v38 }
  0x35   :  { %923 = vmatpush.bf16.msrb.mxu2 %v912_v38 }
  0x37   :  { %225 = vmatpush.bf16.msrb.mxu1 %v757_v17 }
  0x38   :  { %551 = vmatpush.bf16.msrb.mxu0 %v911_v39 }
  0x39   :  { %924 = vmatpush.bf16.msrb.mxu2 %v911_v39 }
  0x3b   :  { %226 = vmatpush.bf16.msrb.mxu1 %v749_v21 }
  0x3c   :  { %552 = vmatpush.bf16.msrb.mxu0 %v910_v41 }
  0x3d   :  { %925 = vmatpush.bf16.msrb.mxu2 %v910_v41 }
  0x3e   :  { %207 = vmatmul.bf16.gmra.mxu0 %v871_v27  ;;  %217 = vmatmul.bf16.gmra.mxu1 %v873_v28 }
  0x3f   :  { %227 = vmatpush.bf16.msrb.mxu1 %v741_v24  ;;  %412 = vmatmul.bf16.gmra.mxu2 %v871_v27 }
  0x40   :  { %553 = vmatpush.bf16.msrb.mxu0 %v909_v45 }
  0x41   :  { %926 = vmatpush.bf16.msrb.mxu2 %v909_v45 }
  0x43   :  { %228 = vmatpush.bf16.msrb.mxu1 %v733_v29  ;;  %441 = vmatmul.bf16.gmra.mxu3 %v871_v27 }
  0x44   :  { %554 = vmatpush.bf16.msrb.mxu0 %v908_v47 }
  0x45   :  { %927 = vmatpush.bf16.msrb.mxu2 %v908_v47 }
  0x47   :  { %229 = vmatpush.bf16.msrb.mxu1 %v725_v32 }
  0x48   :  { %555 = vmatpush.bf16.msrb.mxu0 %v907_v51 }
  0x49   :  { %928 = vmatpush.bf16.msrb.mxu2 %v907_v51 }
  0x4b   :  { %230 = vmatpush.bf16.msrb.mxu1 %v717_v35 }
  0x4c   :  { %556 = vmatpush.bf16.msrb.mxu0 %v906_v55 }
  0x4d   :  { %929 = vmatpush.bf16.msrb.mxu2 %v906_v55 }
  0x4e   :  { %231 = vmatmul.bf16.vlgmr.msrb.gmra.mxu1 %v870_v4 }
  0x4f   :  { %417 = vmatmul.bf16.gmra.mxu2 %v872_v8 }
  0x53   :  { %446 = vmatmul.bf16.gmra.mxu3 %v872_v8 }
  0x5e   :  { %236 = vmatmul.bf16.gmra.mxu1 %v871_v27 }
  0x5f   :  { %422 = vmatmul.bf16.gmra.mxu2 %v873_v28 }
  0x63   :  { %451 = vmatmul.bf16.gmra.mxu3 %v873_v28 }
  0x6e   :  { %241 = vmatmul.bf16.gmra.mxu1 %v872_v8  ;;  %v1041_v8 = vmov 0  }
  0x6f   :  { %938 = vset.pattern.permute.xlu0 %v1041_v8  ;;  %939 = vset.pattern.permute.xlu1 %v1041_v8  ;;  %v618_v16 = vsel %vm610_vm1, 1, %v1041_v8  ;;  %v619_v33 = vsel %vm611_vm2, 1, %v1041_v8 }
  0x70   :  { %940 = vset.pattern.permute.xlu2 %v1041_v8  ;;  %627 = vperm.xlu0 %938, %v618_v16  }
  0x78   :  { %630 = vperm.xlu0 %938, %v619_v33  }
  0x7e   :  { %246 = vmatmul.bf16.gmra.mxu1 %v873_v28 }
  0xab   :  { %v1080_v37 = vpop.f32.mrf.mxu1  ;;  %v1109_v53 = vpop.f32.mrf.mxu0 }
  0xac   :  { %v283_v42 = vrot.slane %v1080_v37, 1  ;;  %v269_v6 = vrot.slane %v1109_v53, 1 }
  0xb2   :  { %v408_v48 = vpop.f32.mrf.mxu2 }
  0xb3   :  { %v215_v40 = vpop.f32.mrf.mxu1  ;;  %v205_v60 = vpop.f32.mrf.mxu0 }
  0xb4   :  { %v287_v43 = vrot.slane %v215_v40, 1  ;;  %v270_v3 = vrot.slane %v205_v60, 1  ;;  %v604_v40 = vld [vmem:[%s1196_s1 + $0x10] sm:$0xff] }
  0xb5   :  { %vm612_vm3 = vcmp.gt.s32.totalorder %v604_v40, 0  ;;  %v608_v60 = vld [vmem:[%s1196_s1 + $0x30] sm:$0xff] }
  0xb6   :  { %v1095_v44 = vsel %vm268_vm0, %v283_v42, %v287_v43  ;;  %v437_v52 = vpop.f32.mrf.mxu3  ;;  %v271_v9 = vsel %vm268_vm0, %v269_v6, %v270_v3  ;;  %v620_v45 = vsel %vm612_vm3, 1, %v1041_v8  ;;  %vm616_vm5 = vcmp.gt.s32.totalorder %v608_v60, 0 }
  0xb7   :  { %v409_v17 = vadd.f32 %v408_v48, %v271_v9  ;;  %633 = vperm.xlu1 %939, %v620_v45   ;;  %v609_v9 = vld [vmem:[%s1196_s1 + $0x38] sm:$0xff] }
  0xb8   :  { %vm617_vm7 = vcmp.gt.s32.totalorder %v609_v9, 0 }
  0xb9   :  { %v457_v23 = vmul.f32 %v409_v17, %v409_v17  ;;  %v625_v16 = vsel %vm617_vm7, 1, %v1041_v8 }
  0xba   :  { %v410_v57 = vpop.f32.mrf.mxu2 }
  0xbb   :  { %v218_v46 = vpop.f32.mrf.mxu1  ;;  %v208_v2 = vpop.f32.mrf.mxu0 }
  0xbc   :  { %v291_v49 = vrot.slane %v218_v46, 1  ;;  %v275_v4 = vrot.slane %v208_v2, 1 }
  0xbe   :  { %v1104_v50 = vsel %vm268_vm0, %v287_v43, %v291_v49  ;;  %v439_v59 = vpop.f32.mrf.mxu3  ;;  %v276_v10 = vsel %vm268_vm0, %v270_v3, %v275_v4 }
  0xbf   :  { %v411_v18 = vadd.f32 %v410_v57, %v276_v10 }
  0xc1   :  { %v458_v24 = vmul.f32 %v411_v18, %v411_v18 }
  0xc2   :  { %v413_v62 = vpop.f32.mrf.mxu2 }
  0xc3   :  { %v1111_v54 = vpop.f32.mrf.mxu1  ;;  %v210_v30 = vpop.f32.mrf.mxu0 }
  0xc4   :  { %v295_v56 = vrot.slane %v1111_v54, 1  ;;  %v279_v35 = vrot.slane %v210_v30, 1 }
  0xc6   :  { %v1120_v58 = vsel %vm268_vm0, %v291_v49, %v295_v56  ;;  %v442_v1 = vpop.f32.mrf.mxu3  ;;  %v280_v39 = vsel %vm268_vm0, %v275_v4, %v279_v35  ;;  %v284_v46 = vsel %vm268_vm0, %v279_v35, %v283_v42  ;;  %v606_v42 = vld [vmem:[%s1196_s1 + $0x20] sm:$0xff] }
  0xc7   :  { %v414_v48 = vadd.f32 %v413_v62, %v280_v39  ;;  %vm614_vm6 = vcmp.gt.s32.totalorder %v606_v42, 0 }
  0xc8   :  { %v622_v10 = vsel %vm614_vm6, 1, %v1041_v8 }
  0xc9   :  { %v459_v37 = vmul.f32 %v414_v48, %v414_v48  ;;  %639 = vperm.xlu2 %940, %v622_v10  }
  0xca   :  { %v415_v11 = vpop.f32.mrf.mxu2 }
  0xcb   :  { %v1122_v61 = vpop.f32.mrf.mxu1  ;;  %v416_v49 = vadd.f32 %v415_v11, %v284_v46  ;;  %v607_v11 = vld [vmem:[%s1196_s1 + $0x28] sm:$0xff] }
  0xcc   :  { %v272_v5 = vrot.slane %v1122_v61, 1  ;;  %vm615_vm8 = vcmp.gt.s32.totalorder %v607_v11, 0 }
  0xcd   :  { %v460_v62 = vmul.f32 %v416_v49, %v416_v49  ;;  %v623_v17 = vsel %vm615_vm8, 1, %v1041_v8 }
  0xce   :  { %v444_v20 = vpop.f32.mrf.mxu3 }
  0xd1   :  { %642 = vperm.xlu2 %940, %v623_v17  }
  0xd2   :  { %v418_v31 = vpop.f32.mrf.mxu2 }
  0xd3   :  { %v234_v63 = vpop.f32.mrf.mxu1 }
  0xd4   :  { %v273_v0 = vrot.slane %v234_v63, 1 }
  0xd6   :  { %v274_v7 = vsel %vm268_vm0, %v272_v5, %v273_v0  ;;  %v447_v38 = vpop.f32.mrf.mxu3 }
  0xd7   :  { %v438_v13 = vadd.f32 %v437_v52, %v274_v7 }
  0xd9   :  { %v465_v21 = vmul.f32 %v438_v13, %v438_v13 }
  0xda   :  { %v420_v51 = vpop.f32.mrf.mxu2 }
  0xdb   :  { %v237_v14 = vpop.f32.mrf.mxu1  ;;  %v473_v28 = vadd.f32 %v465_v21, %v457_v23  ;;  %v421_v23 = vadd.f32 %v420_v51, %v1104_v50 }
  0xdc   :  { %v277_v15 = vrot.slane %v237_v14, 1 }
  0xde   :  { %v278_v19 = vsel %vm268_vm0, %v273_v0, %v277_v15  ;;  %v449_v2 = vpop.f32.mrf.mxu3 }
  0xdf   :  { %v440_v22 = vadd.f32 %v439_v59, %v278_v19  ;;  %v605_v59 = vld [vmem:[%s1196_s1 + $0x18] sm:$0xff]  ;;  %s1042_s1 = smov [#allocation7]  }
  0xe0   :  { %vm613_vm4 = vcmp.gt.s32.totalorder %v605_v59, 0  ;;  %s678_s6 = sshll.u32 %s1042_s1, 4  ;;  %s679_s6 = int_to_ptr.vmem [resolvable:$true] %s678_s6 }
  0xe1   :  { %v466_v25 = vmul.f32 %v440_v22, %v440_v22  ;;  %v621_v0 = vsel %vm613_vm4, 1, %v1041_v8  ;;  %v419_v22 = vadd.f32 %v418_v31, %v1095_v44 }
  0xe2   :  { %636 = vperm.xlu1 %939, %v621_v0   ;;  %v423_v14 = vpop.f32.mrf.mxu2  ;;  %v628_v48 = vpop.permute.xlu0 %627 }
  0xe3   :  { %v239_v27 = vpop.f32.mrf.mxu1  ;;  %v474_v29 = vadd.f32 %v466_v25, %v458_v24  ;;  %v424_v50 = vadd.f32 %v423_v14, %v1120_v58  ;;  %vm650_vm9 = vcmp.eq.s32.totalorder %v628_v48, 1 }
  0xe4   :  { %v281_v32 = vrot.slane %v239_v27, 1  ;;  %v461_v27 = vmul.f32 %v419_v22, %v419_v22 }
  0xe5   :  { %v481_v34 = vpack.c.bf16 %v474_v29, %v473_v28  ;;  %v462_v28 = vmul.f32 %v421_v23, %v421_v23  ;;  %v463_v53 = vmul.f32 %v424_v50, %v424_v50 }
  0xe6   :  { %v282_v36 = vsel %vm268_vm0, %v277_v15, %v281_v32 }
  0xe7   :  { %557 = vmatmul.bf16.vlgmr.msrb.gmra.mxu0 %v481_v34  ;;  %v443_v43 = vadd.f32 %v442_v1, %v282_v36  ;;  %v624_v1 = vsel %vm616_vm5, 1, %v1041_v8  ;;  %v317_v34 = vsel %vm268_vm0, %v295_v56, %v269_v6 }
  0xe8   :  { %645 = vperm.xlu0 %938, %v624_v1  }
  0xe9   :  { %v467_v57 = vmul.f32 %v443_v43, %v443_v43 }
  0xea   :  { %648 = vperm.xlu1 %939, %v625_v16   ;;  %v425_v30 = vpop.f32.mrf.mxu2 }
  0xeb   :  { %v242_v41 = vpop.f32.mrf.mxu1  ;;  %v475_v4 = vadd.f32 %v467_v57, %v459_v37  ;;  %v426_v31 = vadd.f32 %v425_v30, %v317_v34 }
  0xec   :  { %v285_v47 = vrot.slane %v242_v41, 1 }
  0xed   :  { %v464_v43 = vmul.f32 %v426_v31, %v426_v31 }
  0xee   :  { %v286_v52 = vsel %vm268_vm0, %v281_v32, %v285_v47 }
  0xef   :  { %v445_v55 = vadd.f32 %v444_v20, %v286_v52  ;;  %v452_v20 = vpop.f32.mrf.mxu3 }
  0xf1   :  { %v468_v63 = vmul.f32 %v445_v55, %v445_v55  ;;  %v631_v55 = vpop.permute.xlu0 %630 }
  0xf2   :  { %vm651_vm10 = vcmp.eq.s32.totalorder %v631_v55, 1 }
  0xf3   :  { %v244_v3 = vpop.f32.mrf.mxu1  ;;  %v476_v7 = vadd.f32 %v468_v63, %v460_v62 }
  0xf4   :  { %v289_v12 = vrot.slane %v244_v3, 1 }
  0xf5   :  { %v482_v13 = vpack.c.bf16 %v476_v7, %v475_v4 }
  0xf6   :  { %v290_v15 = vsel %vm268_vm0, %v285_v47, %v289_v12 }
  0xf7   :  { %562 = vmatmul.bf16.gmra.mxu0 %v482_v13  ;;  %v448_v19 = vadd.f32 %v447_v38, %v290_v15  ;;  %v454_v36 = vpop.f32.mrf.mxu3 }
  0xf9   :  { %v469_v26 = vmul.f32 %v448_v19, %v448_v19 }
  0xfb   :  { %v247_v18 = vpop.f32.mrf.mxu1  ;;  %v477_v8 = vadd.f32 %v469_v26, %v461_v27 }
  0xfc   :  { %v293_v21 = vrot.slane %v247_v18, 1 }
  0xfe   :  { %v294_v24 = vsel %vm268_vm0, %v289_v12, %v293_v21 }
  0xff   :  { %v450_v25 = vadd.f32 %v449_v2, %v294_v24 }
 0x101   :  { %v470_v29 = vmul.f32 %v450_v25, %v450_v25 }
 0x103   :  { %v249_v32 = vpop.f32.mrf.mxu1  ;;  %v478_v33 = vadd.f32 %v470_v29, %v462_v28 }
 0x104   :  { %v297_v44 = vrot.slane %v249_v32, 1 }
 0x105   :  { %v483_v35 = vpack.c.bf16 %v478_v33, %v477_v8 }
 0x106   :  { %v298_v38 = vsel %vm268_vm0, %v293_v21, %v297_v44  ;;  %v318_v39 = vsel %vm268_vm0, %v297_v44, %v272_v5 }
 0x107   :  { %v453_v40 = vadd.f32 %v452_v20, %v298_v38  ;;  %v455_v41 = vadd.f32 %v454_v36, %v318_v39  ;;  %567 = vmatmul.bf16.gmra.mxu0 %v483_v35 }
 0x109   :  { %v471_v54 = vmul.f32 %v453_v40, %v453_v40  ;;  %v472_v45 = vmul.f32 %v455_v41, %v455_v41 }
 0x10b   :  { %v479_v56 = vadd.f32 %v471_v54, %v463_v53  ;;  %v480_v6 = vadd.f32 %v472_v45, %v464_v43 }
 0x10d   :  { %v484_v46 = vpack.c.bf16 %v480_v6, %v479_v56 }
 0x10f   :  { %572 = vmatmul.bf16.vlgmr.msrb.gmra.mxu2 %v484_v46 }
 0x123   :  { %v640_v13 = vpop.permute.xlu2 %639 }
 0x124   :  { %vm654_vm13 = vcmp.eq.s32.totalorder %v640_v13, 1 }
 0x129   :  { %v634_v62 = vpop.permute.xlu1 %633 }
 0x12a   :  { %vm652_vm11 = vcmp.eq.s32.totalorder %v634_v62, 1 }
 0x12b   :  { %v643_v20 = vpop.permute.xlu2 %642 }
 0x12c   :  { %vm655_vm14 = vcmp.eq.s32.totalorder %v643_v20, 1 }
 0x154   :  { %v637_v4 = vpop.permute.xlu1 %636 }
 0x155   :  { %vm653_vm12 = vcmp.eq.s32.totalorder %v637_v4, 1 }
 0x15a   :  { %v646_v25 = vpop.permute.xlu0 %645 }
 0x15b   :  { %vm656_vm15 = vcmp.eq.s32.totalorder %v646_v25, 1 }
 0x15c   :  { %v649_v32 = vpop.permute.xlu1 %648 }
 0x15d   :  { %vm657_vm0 = vcmp.eq.s32.totalorder %v649_v32, 1 }
 0x164   :  { %v558_v58 = vpop.f32.mrf.mxu0 }
 0x165   :  { %v578_v47 = vmax.f32 %v558_v58, 1e-10 }
 0x167   :  { %941 = vlog2.f32 %v578_v47 }
 0x16c   :  { %v560_v49 = vpop.f32.mrf.mxu0 }
 0x16d   :  { %v942_v51 = vpop.eup %941  ;;  %v579_v61 = vmax.f32 %v560_v49, 1e-10 }
 0x16e   :  { %v587_v5 = vmul.f32 0.6931472, %v942_v51 }
 0x16f   :  { %943 = vlog2.f32 %v579_v61 }
 0x170   :  { %v658_v52 = vsel %vm650_vm9, %v587_v5, 0.0 }
 0x171   :  { %666 = vst [vmem:[#allocation7] sm:$0xff] %v658_v52 }
 0x174   :  { %v563_v57 = vpop.f32.mrf.mxu0 }
 0x175   :  { %v944_v59 = vpop.eup %943  ;;  %v580_v60 = vmax.f32 %v563_v57, 1e-10 }
 0x176   :  { %v589_v37 = vmul.f32 0.6931472, %v944_v59 }
 0x177   :  { %945 = vlog2.f32 %v580_v60 }
 0x178   :  { %v659_v42 = vsel %vm651_vm10, %v589_v37, 0.0 }
 0x179   :  { %667 = vst [vmem:[#allocation7 + $0x8] sm:$0xff] %v659_v42 }
 0x17c   :  { %v565_v63 = vpop.f32.mrf.mxu0 }
 0x17d   :  { %v946_v0 = vpop.eup %945  ;;  %v581_v1 = vmax.f32 %v565_v63, 1e-10 }
 0x17e   :  { %v591_v2 = vmul.f32 0.6931472, %v946_v0 }
 0x17f   :  { %947 = vlog2.f32 %v581_v1 }
 0x180   :  { %v660_v3 = vsel %vm652_vm11, %v591_v2, 0.0 }
 0x181   :  { %668 = vst [vmem:[#allocation7 + $0x10] sm:$0xff] %v660_v3 }
 0x184   :  { %v568_v7 = vpop.f32.mrf.mxu0 }
 0x185   :  { %v948_v9 = vpop.eup %947  ;;  %v582_v10 = vmax.f32 %v568_v7, 1e-10 }
 0x186   :  { %v593_v11 = vmul.f32 0.6931472, %v948_v9 }
 0x187   :  { %949 = vlog2.f32 %v582_v10 }
 0x188   :  { %v661_v12 = vsel %vm653_vm12, %v593_v11, 0.0 }
 0x189   :  { %669 = vst [vmem:[#allocation7 + $0x18] sm:$0xff] %v661_v12 }
 0x18c   :  { %v570_v14 = vpop.f32.mrf.mxu0 }
 0x18d   :  { %v950_v15 = vpop.eup %949  ;;  %v583_v16 = vmax.f32 %v570_v14, 1e-10 }
 0x18e   :  { %v595_v17 = vmul.f32 0.6931472, %v950_v15 }
 0x18f   :  { %951 = vlog2.f32 %v583_v16 }
 0x190   :  { %v662_v18 = vsel %vm654_vm13, %v595_v17, 0.0 }
 0x191   :  { %670 = vst [vmem:[#allocation7 + $0x20] sm:$0xff] %v662_v18 }
 0x192   :  { %v573_v19 = vpop.f32.mrf.mxu2 }
 0x193   :  { %v584_v21 = vmax.f32 %v573_v19, 1e-10 }
 0x195   :  { %v952_v22 = vpop.eup %951  ;;  %953 = vlog2.f32 %v584_v21 }
 0x196   :  { %v597_v23 = vmul.f32 0.6931472, %v952_v22 }
 0x198   :  { %v663_v24 = vsel %vm655_vm14, %v597_v23, 0.0 }
 0x199   :  { %671 = vst [vmem:[#allocation7 + $0x28] sm:$0xff] %v663_v24 }
 0x19a   :  { %v575_v26 = vpop.f32.mrf.mxu2 }
 0x19b   :  { %v954_v27 = vpop.eup %953  ;;  %v585_v28 = vmax.f32 %v575_v26, 1e-10 }
 0x19c   :  { %v599_v29 = vmul.f32 0.6931472, %v954_v27 }
 0x19d   :  { %955 = vlog2.f32 %v585_v28 }
 0x19e   :  { %v664_v30 = vsel %vm656_vm15, %v599_v29, 0.0 }
 0x19f   :  { %672 = vst [vmem:[#allocation7 + $0x30] sm:$0xff] %v664_v30 }
 0x1a3   :  { %v956_v8 = vpop.eup %955 }
 0x1a4   :  { %v601_v33 = vmul.f32 0.6931472, %v956_v8 }
 0x1a6   :  { %v665_v34 = vsel %vm657_vm0, %v601_v33, 0.0 }
 0x1a7   :  { %673 = vst [vmem:[#allocation7 + $0x38] sm:$0xff] %v665_v34 }
 0x1a8   :  { %686 = dma.vmem_to_hbm [thread:$0]  %s679_s6, 1024, %s681_s9, [#allocation4], %s1039_s27, %s1039_s27, %s1040_s28  }
 0x1a9   :  { %1033 = dma.done.wait [#allocation4], 1024  }
 0x1aa   :  { %1034 = vsyncadd [#allocation4], 4294966272 }
 0x1ab   :  { %691 = vsyncpa [#allocation3], 1 }
 0x1ac   :  { %692 = vsyncpa [#allocation6], 1 }
 0x1ad   :  { %693 = vsyncpa [#allocation4], 1 }

</bundles_post_ra>
